<compile_context>
chip_gen: v7x
topology: tpu7x:2x2x1
jax: 0.10.0
libtpu: 0.0.40
codegen_flags: <defaults>
</compile_context>

<pallas_src>
import functools

import jax
import jax.numpy as jnp
from jax.experimental import pallas as pl
from jax.experimental.pallas import tpu as pltpu

LANE = 128


# ---------------------------------------------------------------------------
# Kernel 1: fused conv1 + ReLU + pool1 + conv2 + ReLU + pool2 (batch-folded)
# ---------------------------------------------------------------------------
def _conv_stack_kernel(x_ref, w1_ref, b1_ref, w2_ref, b2_ref, o_ref, *, seq_len):
    # x_ref : (B*L, Cin)   channels-last input, batch folded into rows
    # w1_ref: (3, Cin, H)  b1_ref: (1, H)
    # w2_ref: (3, H, H)    b2_ref: (1, H)
    # o_ref : (B*L//4, H)  pooled conv2 output (f32)
    BL = x_ref.shape[0]
    H = w1_ref.shape[2]
    L = seq_len                   # per-sample length
    L2 = L // 2                   # per-sample length after pool1
    M1 = BL // 2                  # rows after pool1 (= B * L2)
    M2 = BL // 4                  # rows after pool2

    # ---- conv1: three MXU matmuls + masked shift-adds ('same' zero padding) ----
    x = x_ref[...]
    y_m1 = jnp.dot(x, w1_ref[0], preferred_element_type=jnp.float32)  # tap x[t-1]
    y_0 = jnp.dot(x, w1_ref[1], preferred_element_type=jnp.float32)   # tap x[t]
    y_p1 = jnp.dot(x, w1_ref[2], preferred_element_type=jnp.float32)  # tap x[t+1]
    t1 = jax.lax.broadcasted_iota(jnp.int32, (BL, H), 0) % L
    # zero contributions that would cross a sample boundary (== conv 'same' zero padding)
    left = jnp.where(t1 == 0, 0.0, jnp.roll(y_m1, 1, axis=0))
    right = jnp.where(t1 == L - 1, 0.0, jnp.roll(y_p1, -1, axis=0))
    y1 = jnp.maximum(left + y_0 + right + b1_ref[...], 0.0)
    # ---- MaxPool1d(k=2, s=2) over time; pairs never cross samples (L is even) ----
    h1 = jnp.max(y1.reshape(M1, 2, H), axis=1)                         # (B*L2, H)

    # ---- conv2: same scheme ----
    y_m1 = jnp.dot(h1, w2_ref[0], preferred_element_type=jnp.float32)
    y_0 = jnp.dot(h1, w2_ref[1], preferred_element_type=jnp.float32)
    y_p1 = jnp.dot(h1, w2_ref[2], preferred_element_type=jnp.float32)
    t2 = jax.lax.broadcasted_iota(jnp.int32, (M1, H), 0) % L2
    left = jnp.where(t2 == 0, 0.0, jnp.roll(y_m1, 1, axis=0))
    right = jnp.where(t2 == L2 - 1, 0.0, jnp.roll(y_p1, -1, axis=0))
    y2 = jnp.maximum(left + y_0 + right + b2_ref[...], 0.0)
    # ---- second MaxPool ----
    h2 = jnp.max(y2.reshape(M2, 2, H), axis=1)                         # (B*L4, H)
    o_ref[...] = h2.astype(o_ref.dtype)


# ---------------------------------------------------------------------------
# Kernel 2: fused Linear + ReLU (bf16 weight, fp32 accumulation, lane-dense out)
# ---------------------------------------------------------------------------
def _linear_relu_kernel(x_ref, w_ref, b_ref, o_ref):
    x = x_ref[...].astype(w_ref.dtype)     # bf16 operands for the MXU
    acc = jnp.dot(x, w_ref[...], preferred_element_type=jnp.float32)
    o_ref[...] = jnp.maximum(acc + b_ref[...], 0.0).astype(o_ref.dtype)


# ---------------------------------------------------------------------------
# One-time parameter re-layout (host/init-side)
# ---------------------------------------------------------------------------
def prepare_params(params):
    w1 = params["w1"]          # (3, Cin, H)  tap-major conv1 weight
    w2 = params["w2"]          # (3, H, H)
    wf = params["wf"]          # (H*L4, D), rows in PyTorch (channel-major) flatten order
    bf = params["bf"]          # (D,)
    _, _, H = w1.shape
    D = bf.shape[0]
    L4 = wf.shape[0] // H
    Dp = max(LANE, ((D + LANE - 1) // LANE) * LANE)   # lane-dense output width

    # fc weight: reorder rows from channel-major (c*L4 + t) to time-major (t*H + c) so the
    # channels-last conv output flattens directly; pad D to 128 lanes; cast to bf16.
    wf_tm = wf.reshape(H, L4, D).transpose(1, 0, 2).reshape(L4 * H, D)
    wf_p = jnp.pad(wf_tm, ((0, 0), (0, Dp - D))).astype(jnp.bfloat16)
    bf_p = jnp.pad(bf, (0, Dp - D)).reshape(1, Dp).astype(jnp.float32)

    return {
        "w1": w1.astype(jnp.float32),
        "b1": params["b1"].reshape(1, H).astype(jnp.float32),
        "w2": w2.astype(jnp.float32),
        "b2": params["b2"].reshape(1, H).astype(jnp.float32),
        "wf_p": wf_p,
        "bf_p": bf_p,
        "bf": bf,   # kept only so the wrapper can recover the true output dim
    }


# ---------------------------------------------------------------------------
# Full forward (matches the PyTorch module semantics); x_ncl: (N, C_in, L)
# ---------------------------------------------------------------------------
def cnn_forward(x_ncl, prep, *, batch_tile=None):
    N, Cin, L = x_ncl.shape
    assert L % 4 == 0, "two stride-2 pools require L % 4 == 0"
    H = prep["b1"].shape[1]
    D = prep["bf"].shape[0]
    F, Dp = prep["wf_p"].shape
    L4 = L // 4
    assert F == L4 * H

    B = batch_tile or min(N, 8)
    Np = ((N + B - 1) // B) * B
    if Np != N:                                  # pad batch to a multiple of the tile
        x_ncl = jnp.pad(x_ncl, ((0, Np - N), (0, 0), (0, 0)))

    # channels-last; padding / taps are handled in-kernel, so no im2col materialization
    x2d = jnp.transpose(x_ncl, (0, 2, 1)).astype(jnp.float32).reshape(Np * L, Cin)

    # ---- fused conv1 + pool1 + conv2 + pool2 ----
    h2 = pl.pallas_call(
        functools.partial(_conv_stack_kernel, seq_len=L),
        out_shape=jax.ShapeDtypeStruct((Np * L4, H), jnp.float32),
        grid=(Np // B,),
        in_specs=[
            pl.BlockSpec((B * L, Cin), lambda i: (i, 0)),
            pl.BlockSpec((3, Cin, H), lambda i: (0, 0, 0)),
            pl.BlockSpec((1, H), lambda i: (0, 0)),
            pl.BlockSpec((3, H, H), lambda i: (0, 0, 0)),
            pl.BlockSpec((1, H), lambda i: (0, 0)),
        ],
        out_specs=pl.BlockSpec((B * L4, H), lambda i: (i, 0)),
        compiler_params=pltpu.CompilerParams(dimension_semantics=("parallel",)),
    )(x2d, prep["w1"], prep["b1"], prep["w2"], prep["b2"])

    # Free (row-major) flatten: fc weight rows were permuted once in prepare_params,
    # so no HBM transpose is needed here.
    flat = h2.reshape(Np, F)

    # ---- fused Linear + ReLU ----
    out = pl.pallas_call(
        _linear_relu_kernel,
        out_shape=jax.ShapeDtypeStruct((Np, Dp), jnp.float32),
        grid=(Np // B,),
        in_specs=[
            pl.BlockSpec((B, F), lambda i: (i, 0)),
            pl.BlockSpec((F, Dp), lambda i: (0, 0)),
            pl.BlockSpec((1, Dp), lambda i: (0, 0)),
        ],
        out_specs=pl.BlockSpec((B, Dp), lambda i: (i, 0)),
        compiler_params=pltpu.CompilerParams(
            dimension_semantics=("parallel",),
            vmem_limit_bytes=64 * 1024 * 1024),
    )(flat, prep["wf_p"], prep["bf_p"])

    return out[:N, :D]


# ---------------------------------------------------------------------------
# Pure-JAX reference (PyTorch semantics, fp32) for the correctness check
# ---------------------------------------------------------------------------
def reference_forward(x_ncl, params):
    def conv_same(x_nlc, w, b):
        L = x_nlc.shape[1]
        xp = jnp.pad(x_nlc, ((0, 0), (1, 1), (0, 0)))
        return (xp[:, 0:L] @ w[0] + xp[:, 1:L + 1] @ w[1]
                + xp[:, 2:L + 2] @ w[2]) + b

    def pool(y):
        N, L, C = y.shape
        return jnp.max(y.reshape(N, L // 2, 2, C), axis=2)

    x = jnp.transpose(x_ncl, (0, 2, 1))
    x = pool(jax.nn.relu(conv_same(x, params["w1"], params["b1"])))
    x = pool(jax.nn.relu(conv_same(x, params["w2"], params["b2"])))
    x = jnp.transpose(x, (0, 2, 1)).reshape(x.shape[0], -1)   # PyTorch channel-major flatten
    return jax.nn.relu(x @ params["wf"] + params["bf"])


if __name__ == "__main__":
    # Small shapes consistent with the module structure:
    #   N=2, dim_input=4, L=16, dim_hidden=32, dim_output=32, kernel_size=3
    # (the real module's fc1 = 128*323 implies L ~= 1292; scaled down here)
    N, Cin, L = 2, 4, 16
    H, D = 32, 32
    L4 = L // 4

    key = jax.random.PRNGKey(0)
    k1, k2, k3, k4, k5, k6, kx = jax.random.split(key, 7)
    params = {
        "w1": 0.1 * jax.random.normal(k1, (3, Cin, H), jnp.float32),
        "b1": 0.1 * jax.random.normal(k2, (H,), jnp.float32),
        "w2": 0.1 * jax.random.normal(k3, (3, H, H), jnp.float32),
        "b2": 0.1 * jax.random.normal(k4, (H,), jnp.float32),
        "wf": 0.1 * jax.random.normal(k5, (H * L4, D), jnp.float32),
        "bf": 0.1 * jax.random.normal(k6, (D,), jnp.float32),
    }
    x = jax.random.normal(kx, (N, Cin, L), jnp.float32)

    prep = prepare_params(params)          # one-time weight re-layout / bf16 cast
    fwd = jax.jit(cnn_forward)

    out = jax.block_until_ready(fwd(x, prep))
    ref = jax.block_until_ready(reference_forward(x, params))

    assert out.shape == (N, D), out.shape
    # fc weight/activations go through bf16 (fp32 accumulation) -> loosened tolerance
    max_err = float(jnp.max(jnp.abs(out - ref)))
    assert jnp.allclose(out, ref, atol=5e-2, rtol=5e-2), f"mismatch vs reference, max|err|={max_err}"
    print("KERNEL_OK")
</pallas_src>

<mosaic_0001>
module attributes {stable_mosaic.version = 11 : i64} {
  func.func @_linear_relu_kernel(%arg0: i32, %arg1: memref<2x128xf32, #tpu.memory_space<vmem>>, %arg2: memref<128x128xbf16, #tpu.memory_space<vmem>>, %arg3: memref<1x128xf32, #tpu.memory_space<vmem>>, %arg4: memref<2x128xf32, #tpu.memory_space<vmem>>) attributes {dimension_semantics = [#tpu.dimension_semantics<parallel>], iteration_bounds = array<i64: 1>, scalar_prefetch = 0 : i64, scratch_operands = 0 : i64, tpu.core_type = #tpu.core_type<tc>, window_params = [{transform_indices = @transform_0, window_bounds = array<i64: 2, 128>}, {pipeline_mode = #tpu.pipeline_mode<synchronous>, transform_indices = @transform_1, window_bounds = array<i64: 128, 128>}, {pipeline_mode = #tpu.pipeline_mode<synchronous>, transform_indices = @transform_2, window_bounds = array<i64: 1, 128>}, {transform_indices = @transform_3, window_bounds = array<i64: 2, 128>}]} {
    %c0 = arith.constant 0 : index
    %c0_0 = arith.constant 0 : index
    %0 = vector.load %arg1[%c0, %c0_0] : memref<2x128xf32, #tpu.memory_space<vmem>>, vector<2x128xf32>
    %1 = arith.truncf %0 : vector<2x128xf32> to vector<2x128xbf16>
    %c0_1 = arith.constant 0 : index
    %c0_2 = arith.constant 0 : index
    %2 = vector.load %arg2[%c0_1, %c0_2] : memref<128x128xbf16, #tpu.memory_space<vmem>>, vector<128x128xbf16>
    %cst = arith.constant dense<0.000000e+00> : vector<2x128xf32>
    %3 = tpu.matmul %1, %2, %cst {dimension_numbers = #tpu.dot_dimension_numbers<[1], [0], [0], [1], [0, 0, 1, 1], [], []>} : vector<2x128xbf16>, vector<128x128xbf16>, vector<2x128xf32> -> vector<2x128xf32>
    %c0_3 = arith.constant 0 : index
    %c0_4 = arith.constant 0 : index
    %4 = vector.load %arg3[%c0_3, %c0_4] : memref<1x128xf32, #tpu.memory_space<vmem>>, vector<1x128xf32>
    %5 = vector.broadcast %4 : vector<1x128xf32> to vector<2x128xf32>
    %6 = arith.addf %3, %5 : vector<2x128xf32>
    %cst_5 = arith.constant 0.000000e+00 : f32
    %7 = vector.broadcast %cst_5 : f32 to vector<2x128xf32>
    %8 = arith.maximumf %6, %7 : vector<2x128xf32>
    %c0_6 = arith.constant 0 : index
    %c0_7 = arith.constant 0 : index
    %9 = vector.load %arg4[%c0_6, %c0_7] : memref<2x128xf32, #tpu.memory_space<vmem>>, vector<2x128xf32>
    tpu.vector_store %arg4[%c0_6, %c0_7], %8 {strides = array<i32>} : memref<2x128xf32, #tpu.memory_space<vmem>>, vector<2x128xf32>,
    return
  }
  func.func @transform_0(%arg0: i32) -> (i32, i32) {
    %c0_i32 = arith.constant 0 : i32
    %c0_i32_0 = arith.constant 0 : i32
    return %arg0, %c0_i32 : i32, i32
  }
  func.func @transform_1(%arg0: i32) -> (i32, i32) {
    %c0_i32 = arith.constant 0 : i32
    %c0_i32_0 = arith.constant 0 : i32
    %c0_i32_1 = arith.constant 0 : i32
    return %c0_i32, %c0_i32_0 : i32, i32
  }
  func.func @transform_2(%arg0: i32) -> (i32, i32) {
    %c0_i32 = arith.constant 0 : i32
    %c0_i32_0 = arith.constant 0 : i32
    %c0_i32_1 = arith.constant 0 : i32
    return %c0_i32, %c0_i32_0 : i32, i32
  }
  func.func @transform_3(%arg0: i32) -> (i32, i32) {
    %c0_i32 = arith.constant 0 : i32
    %c0_i32_0 = arith.constant 0 : i32
    return %arg0, %c0_i32 : i32, i32
  }
}

module attributes {stable_mosaic.version = 11 : i64} {
  func.func @_conv_stack_kernel(%arg0: i32, %arg1: memref<32x4xf32, #tpu.memory_space<vmem>>, %arg2: memref<3x4x32xf32, #tpu.memory_space<vmem>>, %arg3: memref<1x32xf32, #tpu.memory_space<vmem>>, %arg4: memref<3x32x32xf32, #tpu.memory_space<vmem>>, %arg5: memref<1x32xf32, #tpu.memory_space<vmem>>, %arg6: memref<8x32xf32, #tpu.memory_space<vmem>>) attributes {dimension_semantics = [#tpu.dimension_semantics<parallel>], iteration_bounds = array<i64: 1>, scalar_prefetch = 0 : i64, scratch_operands = 0 : i64, tpu.core_type = #tpu.core_type<tc>, window_params = [{transform_indices = @transform_0, window_bounds = array<i64: 32, 4>}, {pipeline_mode = #tpu.pipeline_mode<synchronous>, transform_indices = @transform_1, window_bounds = array<i64: 3, 4, 32>}, {pipeline_mode = #tpu.pipeline_mode<synchronous>, transform_indices = @transform_2, window_bounds = array<i64: 1, 32>}, {pipeline_mode = #tpu.pipeline_mode<synchronous>, transform_indices = @transform_3, window_bounds = array<i64: 3, 32, 32>}, {pipeline_mode = #tpu.pipeline_mode<synchronous>, transform_indices = @transform_4, window_bounds = array<i64: 1, 32>}, {transform_indices = @transform_5, window_bounds = array<i64: 8, 32>}]} {
    %c0 = arith.constant 0 : index
    %c0_0 = arith.constant 0 : index
    %0 = vector.load %arg1[%c0, %c0_0] : memref<32x4xf32, #tpu.memory_space<vmem>>, vector<32x4xf32>
    %c0_1 = arith.constant 0 : index
    %c0_2 = arith.constant 0 : index
    %c0_3 = arith.constant 0 : index
    %1 = vector.load %arg2[%c0_1, %c0_2, %c0_3] : memref<3x4x32xf32, #tpu.memory_space<vmem>>, vector<1x4x32xf32>
    %2 = vector.shape_cast %1 : vector<1x4x32xf32> to vector<4x32xf32>
    %cst = arith.constant dense<0.000000e+00> : vector<32x32xf32>
    %3 = tpu.matmul %0, %2, %cst {dimension_numbers = #tpu.dot_dimension_numbers<[1], [0], [0], [1], [0, 0, 1, 1], [], []>} : vector<32x4xf32>, vector<4x32xf32>, vector<32x32xf32> -> vector<32x32xf32>
    %c1 = arith.constant 1 : index
    %c0_4 = arith.constant 0 : index
    %c0_5 = arith.constant 0 : index
    %4 = vector.load %arg2[%c1, %c0_4, %c0_5] : memref<3x4x32xf32, #tpu.memory_space<vmem>>, vector<1x4x32xf32>
    %5 = vector.shape_cast %4 : vector<1x4x32xf32> to vector<4x32xf32>
    %cst_6 = arith.constant dense<0.000000e+00> : vector<32x32xf32>
    %6 = tpu.matmul %0, %5, %cst_6 {dimension_numbers = #tpu.dot_dimension_numbers<[1], [0], [0], [1], [0, 0, 1, 1], [], []>} : vector<32x4xf32>, vector<4x32xf32>, vector<32x32xf32> -> vector<32x32xf32>
    %c2 = arith.constant 2 : index
    %c0_7 = arith.constant 0 : index
    %c0_8 = arith.constant 0 : index
    %7 = vector.load %arg2[%c2, %c0_7, %c0_8] : memref<3x4x32xf32, #tpu.memory_space<vmem>>, vector<1x4x32xf32>
    %8 = vector.shape_cast %7 : vector<1x4x32xf32> to vector<4x32xf32>
    %cst_9 = arith.constant dense<0.000000e+00> : vector<32x32xf32>
    %9 = tpu.matmul %0, %8, %cst_9 {dimension_numbers = #tpu.dot_dimension_numbers<[1], [0], [0], [1], [0, 0, 1, 1], [], []>} : vector<32x4xf32>, vector<4x32xf32>, vector<32x32xf32> -> vector<32x32xf32>
    %10 = tpu.iota {dimensions = array<i32: 0>} : vector<32x32xi32>
    %c16_i32 = arith.constant 16 : i32
    %c0_i32 = arith.constant 0 : i32
    %11 = arith.cmpi eq, %c16_i32, %c0_i32 : i32
    %c1_i32 = arith.constant 1 : i32
    %12 = arith.select %11, %c1_i32, %c16_i32 : i32
    %13 = vector.broadcast %12 : i32 to vector<32x32xi32>
    %14 = arith.remsi %10, %13 : vector<32x32xi32>
    %c0_i32_10 = arith.constant 0 : i32
    %15 = vector.broadcast %c0_i32_10 : i32 to vector<32x32xi32>
    %16 = arith.cmpi ne, %14, %15 : vector<32x32xi32>
    %c0_i32_11 = arith.constant 0 : i32
    %17 = vector.broadcast %c0_i32_11 : i32 to vector<32x32xi32>
    %18 = arith.cmpi slt, %14, %17 : vector<32x32xi32>
    %c0_i32_12 = arith.constant 0 : i32
    %19 = arith.cmpi slt, %12, %c0_i32_12 : i32
    %20 = vector.broadcast %19 : i1 to vector<32x32xi1>
    %21 = vector.broadcast %20 : vector<32x32xi1> to vector<32x32xi1>
    %22 = arith.xori %18, %21 : vector<32x32xi1>
    %23 = arith.andi %22, %16 : vector<32x32xi1>
    %24 = vector.broadcast %12 : i32 to vector<32x32xi32>
    %25 = arith.addi %14, %24 : vector<32x32xi32>
    %26 = arith.select %23, %25, %14 : vector<32x32xi1>, vector<32x32xi32>
    %c0_i32_13 = arith.constant 0 : i32
    %27 = vector.broadcast %c0_i32_13 : i32 to vector<32x32xi32>
    %28 = arith.cmpi eq, %26, %27 : vector<32x32xi32>
    %29 = vector.extract_strided_slice %3 {offsets = [31, 0], sizes = [1, 32], strides = [1, 1]} : vector<32x32xf32> to vector<1x32xf32>
    %30 = vector.extract_strided_slice %3 {offsets = [0, 0], sizes = [31, 32], strides = [1, 1]} : vector<32x32xf32> to vector<31x32xf32>
    %31 = tpu.concatenate %29, %30 in 0 : vector<1x32xf32>, vector<31x32xf32> -> vector<32x32xf32>
    %cst_14 = arith.constant 0.000000e+00 : f32
    %32 = vector.broadcast %cst_14 : f32 to vector<32x32xf32>
    %33 = arith.select %28, %32, %31 : vector<32x32xi1>, vector<32x32xf32>
    %c15_i32 = arith.constant 15 : i32
    %34 = vector.broadcast %c15_i32 : i32 to vector<32x32xi32>
    %35 = arith.cmpi eq, %26, %34 : vector<32x32xi32>
    %36 = vector.extract_strided_slice %9 {offsets = [1, 0], sizes = [31, 32], strides = [1, 1]} : vector<32x32xf32> to vector<31x32xf32>
    %37 = vector.extract_strided_slice %9 {offsets = [0, 0], sizes = [1, 32], strides = [1, 1]} : vector<32x32xf32> to vector<1x32xf32>
    %38 = tpu.concatenate %36, %37 in 0 : vector<31x32xf32>, vector<1x32xf32> -> vector<32x32xf32>
    %cst_15 = arith.constant 0.000000e+00 : f32
    %39 = vector.broadcast %cst_15 : f32 to vector<32x32xf32>
    %40 = arith.select %35, %39, %38 : vector<32x32xi1>, vector<32x32xf32>
    %41 = arith.addf %33, %6 : vector<32x32xf32>
    %42 = arith.addf %41, %40 : vector<32x32xf32>
    %c0_16 = arith.constant 0 : index
    %c0_17 = arith.constant 0 : index
    %43 = vector.load %arg3[%c0_16, %c0_17] : memref<1x32xf32, #tpu.memory_space<vmem>>, vector<1x32xf32>
    %44 = vector.broadcast %43 : vector<1x32xf32> to vector<32x32xf32>
    %45 = arith.addf %42, %44 : vector<32x32xf32>
    %cst_18 = arith.constant 0.000000e+00 : f32
    %46 = vector.broadcast %cst_18 : f32 to vector<32x32xf32>
    %47 = arith.maximumf %45, %46 : vector<32x32xf32>
    %48 = vector.shape_cast %47 : vector<32x32xf32> to vector<16x2x32xf32>
    %cst_19 = arith.constant dense<0xFF800000> : vector<16x32xf32>
    %49 = vector.multi_reduction <maximumf>, %48, %cst_19 [1] : vector<16x2x32xf32> to vector<16x32xf32>
    %c0_20 = arith.constant 0 : index
    %c0_21 = arith.constant 0 : index
    %c0_22 = arith.constant 0 : index
    %50 = vector.load %arg4[%c0_20, %c0_21, %c0_22] : memref<3x32x32xf32, #tpu.memory_space<vmem>>, vector<1x32x32xf32>
    %51 = vector.shape_cast %50 : vector<1x32x32xf32> to vector<32x32xf32>
    %cst_23 = arith.constant dense<0.000000e+00> : vector<16x32xf32>
    %52 = tpu.matmul %49, %51, %cst_23 {dimension_numbers = #tpu.dot_dimension_numbers<[1], [0], [0], [1], [0, 0, 1, 1], [], []>} : vector<16x32xf32>, vector<32x32xf32>, vector<16x32xf32> -> vector<16x32xf32>
    %c1_24 = arith.constant 1 : index
    %c0_25 = arith.constant 0 : index
    %c0_26 = arith.constant 0 : index
    %53 = vector.load %arg4[%c1_24, %c0_25, %c0_26] : memref<3x32x32xf32, #tpu.memory_space<vmem>>, vector<1x32x32xf32>
    %54 = vector.shape_cast %53 : vector<1x32x32xf32> to vector<32x32xf32>
    %cst_27 = arith.constant dense<0.000000e+00> : vector<16x32xf32>
    %55 = tpu.matmul %49, %54, %cst_27 {dimension_numbers = #tpu.dot_dimension_numbers<[1], [0], [0], [1], [0, 0, 1, 1], [], []>} : vector<16x32xf32>, vector<32x32xf32>, vector<16x32xf32> -> vector<16x32xf32>
    %c2_28 = arith.constant 2 : index
    %c0_29 = arith.constant 0 : index
    %c0_30 = arith.constant 0 : index
    %56 = vector.load %arg4[%c2_28, %c0_29, %c0_30] : memref<3x32x32xf32, #tpu.memory_space<vmem>>, vector<1x32x32xf32>
    %57 = vector.shape_cast %56 : vector<1x32x32xf32> to vector<32x32xf32>
    %cst_31 = arith.constant dense<0.000000e+00> : vector<16x32xf32>
    %58 = tpu.matmul %49, %57, %cst_31 {dimension_numbers = #tpu.dot_dimension_numbers<[1], [0], [0], [1], [0, 0, 1, 1], [], []>} : vector<16x32xf32>, vector<32x32xf32>, vector<16x32xf32> -> vector<16x32xf32>
    %59 = tpu.iota {dimensions = array<i32: 0>} : vector<16x32xi32>
    %c8_i32 = arith.constant 8 : i32
    %c0_i32_32 = arith.constant 0 : i32
    %60 = arith.cmpi eq, %c8_i32, %c0_i32_32 : i32
    %c1_i32_33 = arith.constant 1 : i32
    %61 = arith.select %60, %c1_i32_33, %c8_i32 : i32
    %62 = vector.broadcast %61 : i32 to vector<16x32xi32>
    %63 = arith.remsi %59, %62 : vector<16x32xi32>
    %c0_i32_34 = arith.constant 0 : i32
    %64 = vector.broadcast %c0_i32_34 : i32 to vector<16x32xi32>
    %65 = arith.cmpi ne, %63, %64 : vector<16x32xi32>
    %c0_i32_35 = arith.constant 0 : i32
    %66 = vector.broadcast %c0_i32_35 : i32 to vector<16x32xi32>
    %67 = arith.cmpi slt, %63, %66 : vector<16x32xi32>
    %c0_i32_36 = arith.constant 0 : i32
    %68 = arith.cmpi slt, %61, %c0_i32_36 : i32
    %69 = vector.broadcast %68 : i1 to vector<16x32xi1>
    %70 = vector.broadcast %69 : vector<16x32xi1> to vector<16x32xi1>
    %71 = arith.xori %67, %70 : vector<16x32xi1>
    %72 = arith.andi %71, %65 : vector<16x32xi1>
    %73 = vector.broadcast %61 : i32 to vector<16x32xi32>
    %74 = arith.addi %63, %73 : vector<16x32xi32>
    %75 = arith.select %72, %74, %63 : vector<16x32xi1>, vector<16x32xi32>
    %c0_i32_37 = arith.constant 0 : i32
    %76 = vector.broadcast %c0_i32_37 : i32 to vector<16x32xi32>
    %77 = arith.cmpi eq, %75, %76 : vector<16x32xi32>
    %78 = vector.extract_strided_slice %52 {offsets = [15, 0], sizes = [1, 32], strides = [1, 1]} : vector<16x32xf32> to vector<1x32xf32>
    %79 = vector.extract_strided_slice %52 {offsets = [0, 0], sizes = [15, 32], strides = [1, 1]} : vector<16x32xf32> to vector<15x32xf32>
    %80 = tpu.concatenate %78, %79 in 0 : vector<1x32xf32>, vector<15x32xf32> -> vector<16x32xf32>
    %cst_38 = arith.constant 0.000000e+00 : f32
    %81 = vector.broadcast %cst_38 : f32 to vector<16x32xf32>
    %82 = arith.select %77, %81, %80 : vector<16x32xi1>, vector<16x32xf32>
    %c7_i32 = arith.constant 7 : i32
    %83 = vector.broadcast %c7_i32 : i32 to vector<16x32xi32>
    %84 = arith.cmpi eq, %75, %83 : vector<16x32xi32>
    %85 = vector.extract_strided_slice %58 {offsets = [1, 0], sizes = [15, 32], strides = [1, 1]} : vector<16x32xf32> to vector<15x32xf32>
    %86 = vector.extract_strided_slice %58 {offsets = [0, 0], sizes = [1, 32], strides = [1, 1]} : vector<16x32xf32> to vector<1x32xf32>
    %87 = tpu.concatenate %85, %86 in 0 : vector<15x32xf32>, vector<1x32xf32> -> vector<16x32xf32>
    %cst_39 = arith.constant 0.000000e+00 : f32
    %88 = vector.broadcast %cst_39 : f32 to vector<16x32xf32>
    %89 = arith.select %84, %88, %87 : vector<16x32xi1>, vector<16x32xf32>
    %90 = arith.addf %82, %55 : vector<16x32xf32>
    %91 = arith.addf %90, %89 : vector<16x32xf32>
    %c0_40 = arith.constant 0 : index
    %c0_41 = arith.constant 0 : index
    %92 = vector.load %arg5[%c0_40, %c0_41] : memref<1x32xf32, #tpu.memory_space<vmem>>, vector<1x32xf32>
    %93 = vector.broadcast %92 : vector<1x32xf32> to vector<16x32xf32>
    %94 = arith.addf %91, %93 : vector<16x32xf32>
    %cst_42 = arith.constant 0.000000e+00 : f32
    %95 = vector.broadcast %cst_42 : f32 to vector<16x32xf32>
    %96 = arith.maximumf %94, %95 : vector<16x32xf32>
    %97 = vector.shape_cast %96 : vector<16x32xf32> to vector<8x2x32xf32>
    %cst_43 = arith.constant dense<0xFF800000> : vector<8x32xf32>
    %98 = vector.multi_reduction <maximumf>, %97, %cst_43 [1] : vector<8x2x32xf32> to vector<8x32xf32>
    %c0_44 = arith.constant 0 : index
    %c0_45 = arith.constant 0 : index
    %99 = vector.load %arg6[%c0_44, %c0_45] : memref<8x32xf32, #tpu.memory_space<vmem>>, vector<8x32xf32>
    tpu.vector_store %arg6[%c0_44, %c0_45], %98 {strides = array<i32>} : memref<8x32xf32, #tpu.memory_space<vmem>>, vector<8x32xf32>,
    return
  }
  func.func @transform_0(%arg0: i32) -> (i32, i32) {
    %c0_i32 = arith.constant 0 : i32
    %c0_i32_0 = arith.constant 0 : i32
    return %arg0, %c0_i32 : i32, i32
  }
  func.func @transform_1(%arg0: i32) -> (i32, i32, i32) {
    %c0_i32 = arith.constant 0 : i32
    %c0_i32_0 = arith.constant 0 : i32
    %c0_i32_1 = arith.constant 0 : i32
    %c0_i32_2 = arith.constant 0 : i32
    return %c0_i32, %c0_i32_0, %c0_i32_1 : i32, i32, i32
  }
  func.func @transform_2(%arg0: i32) -> (i32, i32) {
    %c0_i32 = arith.constant 0 : i32
    %c0_i32_0 = arith.constant 0 : i32
    %c0_i32_1 = arith.constant 0 : i32
    return %c0_i32, %c0_i32_0 : i32, i32
  }
  func.func @transform_3(%arg0: i32) -> (i32, i32, i32) {
    %c0_i32 = arith.constant 0 : i32
    %c0_i32_0 = arith.constant 0 : i32
    %c0_i32_1 = arith.constant 0 : i32
    %c0_i32_2 = arith.constant 0 : i32
    return %c0_i32, %c0_i32_0, %c0_i32_1 : i32, i32, i32
  }
  func.func @transform_4(%arg0: i32) -> (i32, i32) {
    %c0_i32 = arith.constant 0 : i32
    %c0_i32_0 = arith.constant 0 : i32
    %c0_i32_1 = arith.constant 0 : i32
    return %c0_i32, %c0_i32_0 : i32, i32
  }
  func.func @transform_5(%arg0: i32) -> (i32, i32) {
    %c0_i32 = arith.constant 0 : i32
    %c0_i32_0 = arith.constant 0 : i32
    return %arg0, %c0_i32 : i32, i32
  }
}

</mosaic_0001>

<bundles_post_ra>
// kernel: cnn_forward.3
= control target key start
LH: loop header
LB: loop body
LE: loop exit
PB: predicated region body
PF: predicated region fallthrough
CT: control target
= control target key end

     0   :  { %8 = vsyncpa [#allocation3], 0  ;;  %s408_s0 = inlined_call_operand.hbm [shape: f32[2,128], index: 0, kind: input, shape index: {}]   ;;  %s409_s1 = inlined_call_operand.hbm [shape: bf16[128,128], index: 1, kind: input, shape index: {}]   ;;  %s410_s2 = inlined_call_operand.hbm [shape: f32[1,128], index: 2, kind: input, shape index: {}]   ;;  %s411_s3 = inlined_call_operand.hbm [shape: f32[2,128], index: 3, kind: output, shape index: {}]  }
   0x1   :  { %9 = vsyncpa [#allocation6], 0 }
   0x2   :  { %10 = vsyncpa [#allocation4], 0  ;;  %s332_s12 = smov [#allocation5]   ;;  %s238_s16 = scalar_lea.hbm %s409_s1, 1024 }
   0x3   :  { %s26_s13 = sshll.u32 %s332_s12, 4  ;;  %p239_p0 = scmp.ne.s32.totalorder %s409_s1, %s238_s16  ;;  %s27_s13 = int_to_ptr.vmem [resolvable:$true] %s26_s13 }
   0x4   :  { %p242_p1 = scmp.lt.u32.totalorder %s238_s16, %s409_s1 }
   0x6   :  { %p244_p2 = pnand %p242_p1, %p239_p0 }
   0x8   :  { %247 = shalt.err (!%p244_p2)
}
   0x9   :  { %s248_s21 = scalar_lea.vmem %s27_s13, 1024  ;;  %p253_p4 = scmp.lt.s32.totalorder %s27_s13, %s27_s13 }
   0xa   :  { %p249_p3 = scmp.ne.s32.totalorder %s27_s13, %s248_s21  ;;  %p254_p5 = scmp.lt.s32.totalorder %s248_s21, %s248_s21 }
   0xc   :  { %p255_p6 = por %p254_p5, %p253_p4 }
   0xe   :  { %p256_p7 = pnand %p255_p6, %p249_p3 }
  0x10   :  { %259 = shalt.err (!%p256_p7)
}
  0x11   :  { %s333_s22 = smov 64   ;;  %s334_s23 = smov 4  }
  0x12   :  { %32 = dma.hbm_to_vmem [thread:$0]  %s409_s1, 1024, %s27_s13, [#allocation6], %s333_s22, %s333_s22, %s334_s23  }
  0x13   :  { %s335_s26 = smov [#allocation2]   ;;  %s336_s28 = smov [#allocation7]  }
  0x14   :  { %s17_s27 = sshll.u32 %s335_s26, 4  ;;  %s39_s29 = sshll.u32 %s336_s28, 4  ;;  %s18_s27 = int_to_ptr.vmem [resolvable:$true] %s17_s27  ;;  %s40_s29 = int_to_ptr.vmem [resolvable:$true] %s39_s29 }
  0x15   :  { %s260_s5 = scalar_lea.hbm %s408_s0, 32 }
  0x16   :  { %p261_p8 = scmp.ne.s32.totalorder %s408_s0, %s260_s5  ;;  %p264_p9 = scmp.lt.u32.totalorder %s260_s5, %s408_s0 }
  0x18   :  { %p266_p10 = pnand %p264_p9, %p261_p8 }
  0x1a   :  { %269 = shalt.err (!%p266_p10)
}
  0x1b   :  { %s270_s1 = scalar_lea.vmem %s18_s27, 32  ;;  %p275_p12 = scmp.lt.s32.totalorder %s18_s27, %s18_s27 }
  0x1c   :  { %p271_p11 = scmp.ne.s32.totalorder %s18_s27, %s270_s1  ;;  %p276_p13 = scmp.lt.s32.totalorder %s270_s1, %s270_s1 }
  0x1e   :  { %p277_p0 = por %p276_p13, %p275_p12 }
  0x20   :  { %p278_p1 = pnand %p277_p0, %p271_p11 }
  0x22   :  { %281 = shalt.err (!%p278_p1)
}
  0x23   :  { %20 = dma.hbm_to_vmem [thread:$0]  %s408_s0, 32, %s18_s27, [#allocation3]  }
  0x24   :  { %s282_s14 = scalar_lea.hbm %s410_s2, 16 }
  0x25   :  { %p283_p2 = scmp.ne.s32.totalorder %s410_s2, %s282_s14  ;;  %p286_p3 = scmp.lt.u32.totalorder %s282_s14, %s410_s2 }
  0x27   :  { %p288_p4 = pnand %p286_p3, %p283_p2 }
  0x29   :  { %291 = shalt.err (!%p288_p4)
}
  0x2a   :  { %s292_s19 = scalar_lea.vmem %s40_s29, 16  ;;  %s296_s20 = scalar_lea.vmem %s40_s29, 32 }
  0x2b   :  { %p293_p5 = scmp.ne.s32.totalorder %s40_s29, %s292_s19  ;;  %p297_p6 = scmp.lt.s32.totalorder %s40_s29, %s40_s29 }
  0x2c   :  { %p298_p7 = scmp.lt.s32.totalorder %s296_s20, %s292_s19 }
  0x2e   :  { %p299_p8 = por %p298_p7, %p297_p6 }
  0x30   :  { %p300_p9 = pnand %p299_p8, %p293_p5 }
  0x32   :  { %303 = shalt.err (!%p300_p9)
}
  0x33   :  { %42 = dma.hbm_to_vmem [thread:$0]  %s410_s2, 16, %s40_s29, [#allocation6]  }
  0x34   :  { %326 = dma.done.wait [#allocation3], 32  }
  0x35   :  { %327 = vsyncadd [#allocation3], 4294967264 }
  0x36   :  { %328 = dma.done.wait [#allocation6], 1040  }
  0x37   :  { %329 = vsyncadd [#allocation6], 4294966256  ;;  %v337_v0 = vmov 0.0   ;;  %vm338_vm0 = vmmov 0   ;;  %v230_v1 = vld [vmem:[#allocation5] sm:$0xff]   ;;  %v231_v2 = vld [vmem:[#allocation5 + $0x8] sm:$0xff]  }
  0x38   :  { %202 = vmatprep.subr.bf16.mxu0 %v337_v0  ;;  %218 = vmatprep.mubr.msk.bf16.mxu0 %vm338_vm0, %v337_v0  ;;  %v232_v3 = vld [vmem:[#allocation5 + $0x10] sm:$0xff]   ;;  %v233_v4 = vld [vmem:[#allocation5 + $0x18] sm:$0xff]   ;;  %v234_v5 = vld [vmem:[#allocation5 + $0x20] sm:$0xff]   ;;  %s339_s2 = smov [#allocation8]  }
  0x39   :  { %203 = vmatpush3.bf16.msra.mxu0 %v230_v1  ;;  %v235_v6 = vld [vmem:[#allocation5 + $0x28] sm:$0xff]   ;;  %v236_v7 = vld [vmem:[#allocation5 + $0x30] sm:$0xff]   ;;  %v237_v8 = vld [vmem:[#allocation5 + $0x38] sm:$0xff]   ;;  %s174_s22 = sshll.u32 %s339_s2, 4  ;;  %s175_s22 = int_to_ptr.vmem [resolvable:$true] %s174_s22 }
  0x3a   :  { %204 = vmatprep.subr.bf16.mxu0 %v337_v0  ;;  %v53_v9 = vld [vmem:[#allocation2] sm:$0x3]  ;;  %v184_v11 = vld [vmem:[#allocation7] ss:$0 sm:$0xff]  ;;  %s304_s23 = scalar_lea.vmem %s175_s22, 32  ;;  %p309_p11 = scmp.lt.s32.totalorder %s175_s22, %s175_s22 }
  0x3b   :  { %v54_v10 = vpack.c.bf16 %v53_v9, %v53_v9  ;;  %p305_p10 = scmp.ne.s32.totalorder %s175_s22, %s304_s23  ;;  %p310_p12 = scmp.lt.s32.totalorder %s304_s23, %s304_s23 }
  0x3d   :  { %205 = vmatpush3.bf16.msra.mxu0 %v231_v2  ;;  %p311_p13 = por %p310_p12, %p309_p11 }
  0x3e   :  { %206 = vmatprep.subr.bf16.mxu0 %v337_v0 }
  0x3f   :  { %p312_p0 = pnand %p311_p13, %p305_p10 }
  0x41   :  { %207 = vmatpush3.bf16.msra.mxu0 %v232_v3 }
  0x42   :  { %208 = vmatprep.subr.bf16.mxu0 %v337_v0 }
  0x45   :  { %209 = vmatpush3.bf16.msra.mxu0 %v233_v4 }
  0x46   :  { %210 = vmatprep.subr.bf16.mxu0 %v337_v0 }
  0x49   :  { %211 = vmatpush3.bf16.msra.mxu0 %v234_v5 }
  0x4a   :  { %212 = vmatprep.subr.bf16.mxu0 %v337_v0 }
  0x4d   :  { %213 = vmatpush3.bf16.msra.mxu0 %v235_v6 }
  0x4e   :  { %214 = vmatprep.subr.bf16.mxu0 %v337_v0 }
  0x51   :  { %215 = vmatpush3.bf16.msra.mxu0 %v236_v7 }
  0x52   :  { %216 = vmatprep.subr.bf16.mxu0 %v337_v0 }
  0x55   :  { %217 = vmatpush3.bf16.msra.mxu0 %v237_v8 }
  0x58   :  { %219 = vmatmul.mubr.bf16.vlgmr.msra.gmra.mrb[0].mxu0 %v54_v10 }
 0x12b   :  { %v160_v12 = vpop.f32.mrb[0].mxu0 }
 0x12c   :  { %v161_v13 = vadd.f32 %v184_v11, %v160_v12  ;;  %v220_v14 = vpop.f32.mrb[1].mxu0 }
 0x12d   :  { %v163_v15 = vpop.f32.mrb[2].mxu0 }
 0x12e   :  { %v166_v16 = vmax.f32 %v161_v13, 0.0  ;;  %v221_v17 = vpop.f32.mrb[3].mxu0 }
 0x130   :  { %167 = vst [vmem:[#allocation8] sm:$0x3] %v166_v16 }
 0x131   :  { %315 = shalt.err (!%p312_p0)
}
 0x132   :  { %s316_s26 = scalar_lea.hbm %s411_s3, 32 }
 0x133   :  { %p317_p1 = scmp.ne.s32.totalorder %s411_s3, %s316_s26  ;;  %p320_p2 = scmp.lt.u32.totalorder %s316_s26, %s411_s3 }
 0x135   :  { %p322_p3 = pnand %p320_p2, %p317_p1 }
 0x137   :  { %325 = shalt.err (!%p322_p3)
}
 0x138   :  { %177 = dma.vmem_to_hbm [thread:$0]  %s175_s22, 32, %s411_s3, [#allocation4]  }
 0x139   :  { %330 = dma.done.wait [#allocation4], 32  }
 0x13a   :  { %331 = vsyncadd [#allocation4], 4294967264 }
 0x13b   :  { %181 = vsyncpa [#allocation3], 1 }
 0x13c   :  { %182 = vsyncpa [#allocation6], 1 }
 0x13d   :  { %183 = vsyncpa [#allocation4], 1 }

// kernel: cnn_forward.2
= control target key start
LH: loop header
LB: loop body
LE: loop exit
PB: predicated region body
PF: predicated region fallthrough
CT: control target
= control target key end

     0   :  { %10 = vsyncpa [#allocation3], 0  ;;  %s1285_s18 = smov [#allocation2]   ;;  %s1513_s0 = inlined_call_operand.vmem [shape: f32[32,4], index: 0, kind: input, shape index: {}]   ;;  %s1514_s1 = inlined_call_operand.vmem [shape: f32[3,4,32], index: 1, kind: input, shape index: {}]   ;;  %s1515_s2 = inlined_call_operand.vmem [shape: f32[1,32], index: 2, kind: input, shape index: {}]   ;;  %s1516_s3 = inlined_call_operand.hbm [shape: f32[3,32,32], index: 3, kind: input, shape index: {}]   ;;  %s1517_s4 = inlined_call_operand.vmem [shape: f32[1,32], index: 4, kind: input, shape index: {}]   ;;  %s1518_s5 = inlined_call_operand.vmem [shape: f32[8,32], index: 5, kind: output, shape index: {}]  }
   0x1   :  { %s22_s19 = sshll.u32 %s1285_s18, 4  ;;  %s1261_s22 = scalar_lea.hbm %s1516_s3, 1536  ;;  %s23_s19 = int_to_ptr.vmem [resolvable:$true] %s22_s19 }
   0x2   :  { %p1262_p0 = scmp.ne.s32.totalorder %s1516_s3, %s1261_s22  ;;  %p1265_p1 = scmp.lt.u32.totalorder %s1261_s22, %s1516_s3 }
   0x4   :  { %p1267_p2 = pnand %p1265_p1, %p1262_p0 }
   0x6   :  { %1270 = shalt.err (!%p1267_p2)
}
   0x7   :  { %s1271_s27 = scalar_lea.vmem %s23_s19, 1536  ;;  %p1276_p4 = scmp.lt.s32.totalorder %s23_s19, %s23_s19 }
   0x8   :  { %p1272_p3 = scmp.ne.s32.totalorder %s23_s19, %s1271_s27  ;;  %p1277_p5 = scmp.lt.s32.totalorder %s1271_s27, %s1271_s27 }
   0xa   :  { %p1278_p6 = por %p1277_p5, %p1276_p4 }
   0xc   :  { %p1279_p7 = pnand %p1278_p6, %p1272_p3 }
   0xe   :  { %1282 = shalt.err (!%p1279_p7)
}
   0xf   :  { %s1286_s28 = smov 128   ;;  %s1287_s29 = smov 8  }
  0x10   :  { %28 = dma.hbm_to_vmem [thread:$0]  %s1516_s3, 1536, %s23_s19, [#allocation3], %s1286_s28, %s1286_s28, %s1287_s29  }
  0x11   :  { %1283 = dma.done.wait [#allocation3], 1536  }
  0x12   :  { %1284 = vsyncadd [#allocation3], 4294965760  ;;  %vm52_vm0 = vcmask 1043456   ;;  %vm39_vm1 = vcmask 31744   ;;  %v38_v0 = vld [vmem:[%s1514_s1] sm:$0xf]  ;;  %v321_v22 = vlaneseq }
  0x13   :  { %v34_v1 = vld [vmem:[%s1513_s0] sm:$0xff]  ;;  %v35_v2 = vld [vmem:[%s1513_s0 + $0x8] sm:$0xff]  ;;  %1176 = vmatprep.subr.msk.mxu0 %vm52_vm0, %v38_v0  ;;  %v36_v5 = vld [vmem:[%s1513_s0 + $0x10] sm:$0xff]  ;;  %vm384_vm2 = vcmask 1040384   ;;  %v1288_v43 = vmov 1983009808  }
  0x14   :  { %1178 = vmatprep.mubr.msk.f32.mxu0 %vm39_vm1, %v34_v1  ;;  %v1129_v3 = vld [vmem:[%s1514_s1 + $0x8] sm:$0xf]  ;;  %v1123_v4 = vld [vmem:[%s1514_s1 + $0x4] sm:$0xf]  ;;  %1177 = vmatpush3.msk.msra.mxu0 %vm52_vm0, %v38_v0  ;;  %v37_v6 = vld [vmem:[%s1513_s0 + $0x18] sm:$0xff]  ;;  %v1373_v23 = vshrl.u32 %v321_v22, 7  ;;  %v455_v44 = vunpack.c.l.s4 %v1288_v43 }
  0x15   :  { %1184 = vmatprep.subr.msk.mxu1 %vm52_vm0, %v1123_v4  ;;  %1179 = vmatmul.mubr.msk.f32.vlgmr.msra.gmra.mrb[0].mxu0 %vm39_vm1, %v35_v2  ;;  %v650_v7 = vld [vmem:[#allocation2] sm:$0xff]  ;;  %v651_v8 = vld [vmem:[#allocation2 + $0x8] sm:$0xff]  ;;  %v652_v13 = vld [vmem:[#allocation2 + $0x10] sm:$0xff]  ;;  %vm408_vm5 = vcmask 1046528   ;;  %vm537_vm8 = vcmask 254976   ;;  %vm670_vm9 = vcmask 1041409  }
  0x16   :  { %1192 = vmatprep.subr.msk.mxu0 %vm52_vm0, %v1129_v3  ;;  %1181 = vmatprep.mubr.msk.f32.mxu0 %vm39_vm1, %v36_v5  ;;  %v1233_v9 = vpack.c.bf16 %v651_v8, %v650_v7  ;;  %v772_v10 = vld [vmem:[#allocation2 + $0x20] sm:$0xff]  ;;  %v773_v11 = vld [vmem:[#allocation2 + $0x28] sm:$0xff]  ;;  %v653_v14 = vld [vmem:[#allocation2 + $0x18] sm:$0xff]  ;;  %v324_v24 = vadd.s32 16, %v1373_v23  ;;  %v330_v28 = vand.u32 15, %v1373_v23  ;;  %v325_v35 = vadd.s32 24, %v1373_v23 }
  0x17   :  { %1193 = vmatpush3.msk.msra.mxu0 %vm52_vm0, %v1129_v3  ;;  %1185 = vmatpush3.msk.msra.mxu1 %vm52_vm0, %v1123_v4  ;;  %v1241_v12 = vpack.c.bf16 %v773_v11, %v772_v10  ;;  %v774_v15 = vld [vmem:[#allocation2 + $0x30] sm:$0xff]  ;;  %v1237_v16 = vpack.c.bf16 %v653_v14, %v652_v13  ;;  %v775_v17 = vld [vmem:[#allocation2 + $0x38] sm:$0xff]  ;;  %v852_v19 = vld [vmem:[#allocation2 + $0x40] sm:$0xff]  ;;  %v1384_v41 = vadd.s32 8, %v1373_v23  ;;  %v456_v60 = vunpack.c.0.s8 %v455_v44 }
  0x18   :  { %1186 = vmatprep.mubr.msk.f32.mxu1 %vm39_vm1, %v34_v1  ;;  %1234 = vmatprep.subr.bf16.mxu1 %v1233_v9  ;;  %v1245_v18 = vpack.c.bf16 %v775_v17, %v774_v15  ;;  %v853_v20 = vld [vmem:[#allocation2 + $0x48] sm:$0xff]  ;;  %v344_v30 = vand.u32 15, %v324_v24  ;;  %vm374_vm3 = vcmp.eq.s32.totalorder %v330_v28, 0  ;;  %v351_v51 = vand.u32 15, %v325_v35  ;;  %v1135_v62 = vld [vmem:[%s1515_s2] ss:$0 sm:$0xff] }
  0x19   :  { %1187 = vmatmul.mubr.msk.f32.vlgmr.msra.gmra.mrb[0].mxu1 %vm39_vm1, %v35_v2  ;;  %1182 = vmatmul.mubr.msk.f32.gmra.mrb[2].mxu0 %vm39_vm1, %v37_v6  ;;  %v1370_v21 = vpack.c.bf16 %v853_v20, %v852_v19  ;;  %v337_v59 = vand.u32 15, %v1384_v41  ;;  %v1397_v4 = vsub.s32 %v456_v60, %v1373_v23  ;;  %vm672_vm10 = vcmask 1042434  }
  0x1a   :  { %1189 = vmatprep.mubr.msk.f32.mxu1 %vm39_vm1, %v36_v5  ;;  %1194 = vmatprep.mubr.msk.f32.mxu0 %vm39_vm1, %v34_v1  ;;  %vm1379_vm4 = vcmp.eq.s32.totalorder %v344_v30, 0  ;;  %vm403_vm6 = vcmp.eq.s32.totalorder %v351_v51, 15  ;;  %vm674_vm11 = vcmask 1043459   ;;  %vm676_vm12 = vcmask 1044484  }
  0x1b   :  { %1236 = vmatpush3.bf16.msra.mxu1 %v1233_v9  ;;  %1242 = vmatprep.subr.bf16.mxu0 %v1241_v12  ;;  %vm401_vm7 = vcmp.eq.s32.totalorder %v337_v59, 15  ;;  %vm678_vm13 = vcmask 1045509   ;;  %vm680_vm14 = vcmask 1046534   ;;  %vm682_vm15 = vcmask 1047559  }
  0x1c   :  { %1238 = vmatprep.subr.bf16.mxu1 %v1237_v16  ;;  %vm691_vm0 = vcmask 261120  }
  0x1d   :  { %1190 = vmatmul.mubr.msk.f32.gmra.mrb[2].mxu1 %vm39_vm1, %v37_v6  ;;  %1195 = vmatmul.mubr.msk.f32.vlgmr.msra.gmra.mrb[4].mxu0 %vm39_vm1, %v35_v2 }
  0x1e   :  { %1197 = vmatprep.mubr.msk.f32.mxu0 %vm39_vm1, %v36_v5  ;;  %1244 = vmatpush3.bf16.msra.mxu0 %v1241_v12 }
  0x1f   :  { %1246 = vmatprep.subr.bf16.mxu0 %v1245_v18  ;;  %1240 = vmatpush3.bf16.msra.mxu1 %v1237_v16 }
  0x20   :  { %1250 = vmatprep.subr.bf16.mxu1 %v1370_v21 }
  0x21   :  { %1198 = vmatmul.mubr.msk.f32.gmra.mrb[6].mxu0 %vm39_vm1, %v37_v6 }
  0x22   :  { %1248 = vmatpush3.bf16.msra.mxu0 %v1245_v18 }
  0xe8   :  { %v1180_v25 = vpop.f32.mrb[0].mxu0 }
  0xe9   :  { %v386_v26 = vrot.slane %v1180_v25, 7  ;;  %v122_v27 = vpop.f32.mrb[1].mxu0 }
  0xea   :  { %v385_v29 = vrot.slane %v122_v27, 7 }
  0xec   :  { %v1188_v31 = vpop.f32.mrb[0].mxu1  ;;  %v1183_v32 = vpop.f32.mrb[2].mxu0  ;;  %v387_v33 = vsel %vm384_vm2, %v385_v29, %v386_v26 }
  0xed   :  { %v212_v34 = vpop.f32.mrb[1].mxu1  ;;  %v379_v36 = vrot.slane %v1183_v32, 7  ;;  %v427_v37 = vadd.f32 %v1188_v31, %v387_v33  ;;  %v132_v38 = vpop.f32.mrb[3].mxu0 }
  0xee   :  { %v388_v39 = vrot.slane %v132_v38, 7 }
  0xef   :  { %v395_v42 = vsel %vm384_vm2, %v379_v36, %v385_v29 }
  0xf0   :  { %v1191_v45 = vpop.f32.mrb[2].mxu1  ;;  %v396_v46 = vsel %vm374_vm3, 0.0, %v395_v42  ;;  %v390_v47 = vsel %vm384_vm2, %v388_v39, %v379_v36  ;;  %v1196_v48 = vpop.f32.mrb[4].mxu0  ;;  %v389_v50 = vsel %vm384_vm2, %v386_v26, %v388_v39 }
  0xf1   :  { %v222_v49 = vpop.f32.mrb[3].mxu1  ;;  %v426_v52 = vadd.f32 %v396_v46, %v212_v34  ;;  %v429_v53 = vadd.f32 %v1191_v45, %v390_v47  ;;  %v410_v54 = vrot.slane %v1196_v48, 1  ;;  %v398_v55 = vsel %vm1379_vm4, 0.0, %v389_v50  ;;  %v302_v56 = vpop.f32.mrb[5].mxu0 }
  0xf2   :  { %v428_v57 = vadd.f32 %v398_v55, %v222_v49  ;;  %v409_v58 = vrot.slane %v302_v56, 1 }
  0xf4   :  { %v411_v61 = vsel %vm408_vm5, %v409_v58, %v410_v54  ;;  %v1199_v63 = vpop.f32.mrb[6].mxu0 }
  0xf5   :  { %v430_v0 = vadd.f32 %v426_v52, %v411_v61  ;;  %v414_v1 = vrot.slane %v1199_v63, 1  ;;  %v312_v2 = vpop.f32.mrb[7].mxu0 }
  0xf6   :  { %v412_v3 = vrot.slane %v312_v2, 1 }
  0xf7   :  { %v441_v5 = vadd.f32 %v1135_v62, %v430_v0  ;;  %v421_v6 = vsel %vm408_vm5, %v414_v1, %v409_v58 }
  0xf8   :  { %v425_v7 = vsel %vm403_vm6, 0.0, %v421_v6  ;;  %v413_v8 = vsel %vm408_vm5, %v410_v54, %v412_v3  ;;  %v415_v9 = vsel %vm408_vm5, %v412_v3, %v414_v1 }
  0xf9   :  { %v445_v10 = vmax.f32 %v441_v5, 0.0  ;;  %v433_v11 = vadd.f32 %v429_v53, %v425_v7  ;;  %v423_v12 = vsel %vm401_vm7, 0.0, %v413_v8  ;;  %v432_v13 = vadd.f32 %v428_v57, %v415_v9 }
  0xfa   :  { %v431_v14 = vadd.f32 %v427_v37, %v423_v12 }
  0xfb   :  { %v453_v15 = vcombine.high %v445_v10, %v445_v10  ;;  %v460_v16 = vrot.slane %v445_v10, %v1397_v4  ;;  %v444_v17 = vadd.f32 %v1135_v62, %v433_v11  ;;  %v443_v19 = vadd.f32 %v1135_v62, %v432_v13 }
  0xfc   :  { %v442_v18 = vadd.f32 %v1135_v62, %v431_v14 }
  0xfd   :  { %v467_v20 = vrot.slane %v453_v15, %v1397_v4  ;;  %v468_v22 = vcombine.high %v460_v16, %v460_v16  ;;  %v538_v24 = vsel %vm537_vm8, %v460_v16, -inf  ;;  %v448_v25 = vmax.f32 %v444_v17, 0.0 }
  0xfe   :  { %v539_v26 = vrot.slane %v538_v24, 4  ;;  %v446_v27 = vmax.f32 %v442_v18, 0.0  ;;  %v447_v38 = vmax.f32 %v443_v19, 0.0 }
  0xff   :  { %v469_v28 = vcombine.high %v467_v20, %v467_v20  ;;  %v545_v29 = vsel %vm537_vm8, %v468_v22, -inf  ;;  %v552_v30 = vsel %vm537_vm8, %v467_v20, -inf  ;;  %v504_v31 = vcombine.high %v448_v25, %v448_v25 }
 0x100   :  { %v540_v32 = vmax.f32 %v538_v24, %v539_v26  ;;  %v546_v33 = vrot.slane %v545_v29, 4  ;;  %v553_v34 = vrot.slane %v552_v30, 4  ;;  %v511_v35 = vrot.slane %v448_v25, %v1397_v4 }
 0x101   :  { %v559_v36 = vsel %vm537_vm8, %v469_v28, -inf  ;;  %v1410_v37 = vrot.slane %v504_v31, %v1397_v4  ;;  %v470_v39 = vcombine.high %v446_v27, %v446_v27  ;;  %v477_v48 = vrot.slane %v446_v27, %v1397_v4 }
 0x102   :  { %v541_v40 = vrot.slane %v540_v32, 2  ;;  %v547_v42 = vmax.f32 %v545_v29, %v546_v33  ;;  %v554_v43 = vmax.f32 %v552_v30, %v553_v34  ;;  %v560_v44 = vrot.slane %v559_v36, 4 }
 0x103   :  { %v519_v45 = vcombine.high %v511_v35, %v511_v35  ;;  %v622_v46 = vsel %vm537_vm8, %v511_v35, -inf  ;;  %v636_v47 = vsel %vm537_vm8, %v1410_v37, -inf  ;;  %v520_v58 = vcombine.high %v1410_v37, %v1410_v37 }
 0x104   :  { %v542_v49 = vmax.f32 %v540_v32, %v541_v40  ;;  %v548_v50 = vrot.slane %v547_v42, 2  ;;  %v555_v51 = vrot.slane %v554_v43, 2  ;;  %v561_v52 = vmax.f32 %v559_v36, %v560_v44 }
 0x105   :  { %v623_v53 = vrot.slane %v622_v46, 4  ;;  %v629_v54 = vsel %vm537_vm8, %v519_v45, -inf  ;;  %v637_v55 = vrot.slane %v636_v47, 4  ;;  %v485_v62 = vcombine.high %v477_v48, %v477_v48 }
 0x106   :  { %v543_v56 = vrot.slane %v542_v49, 1  ;;  %v549_v57 = vmax.f32 %v547_v42, %v548_v50  ;;  %v1419_v59 = vmax.f32 %v554_v43, %v555_v51  ;;  %v630_v61 = vrot.slane %v629_v54, 4 }
 0x107   :  { %v624_v60 = vmax.f32 %v622_v46, %v623_v53  ;;  %v562_v63 = vrot.slane %v561_v52, 2  ;;  %v1421_v0 = vmax.f32 %v636_v47, %v637_v55  ;;  %v1424_v1 = vrot.slane %v470_v39, %v1397_v4 }
 0x108   :  { %v487_v2 = vcombine.high %v447_v38, %v447_v38  ;;  %v1426_v3 = vmax.f32 %v542_v49, %v543_v56  ;;  %v631_v6 = vmax.f32 %v629_v54, %v630_v61  ;;  %v494_v7 = vrot.slane %v447_v38, %v1397_v4 }
 0x109   :  { %v625_v5 = vrot.slane %v624_v60, 2  ;;  %v550_v8 = vrot.slane %v549_v57, 1  ;;  %v566_v10 = vsel %vm537_vm8, %v477_v48, -inf  ;;  %v573_v11 = vsel %vm537_vm8, %v485_v62, -inf }
 0x10a   :  { %v501_v9 = vrot.slane %v487_v2, %v1397_v4  ;;  %v557_v12 = vrot.slane %v1419_v59, 1  ;;  %v502_v14 = vcombine.high %v494_v7, %v494_v7  ;;  %v567_v15 = vrot.slane %v566_v10, 4 }
 0x10b   :  { %v1433_v13 = vmax.f32 %v624_v60, %v625_v5  ;;  %v632_v16 = vrot.slane %v631_v6, 2  ;;  %v594_v18 = vsel %vm537_vm8, %v494_v7, -inf  ;;  %v639_v20 = vrot.slane %v1421_v0, 2 }
 0x10c   :  { %v503_v17 = vcombine.high %v501_v9, %v501_v9  ;;  %v608_v19 = vsel %vm537_vm8, %v501_v9, -inf  ;;  %v568_v22 = vmax.f32 %v566_v10, %v567_v15  ;;  %v574_v24 = vrot.slane %v573_v11, 4 }
 0x10d   :  { %v595_v25 = vrot.slane %v594_v18, 4  ;;  %v551_v26 = vmax.f32 %v549_v57, %v550_v8  ;;  %v601_v27 = vsel %vm537_vm8, %v502_v14, -inf  ;;  %v609_v28 = vrot.slane %v608_v19, 4 }
 0x10e   :  { %v615_v29 = vsel %vm537_vm8, %v503_v17, -inf  ;;  %v627_v30 = vrot.slane %v1433_v13, 1  ;;  %v569_v31 = vrot.slane %v568_v22, 2  ;;  %v602_v33 = vrot.slane %v601_v27, 4 }
 0x10f   :  { %v596_v32 = vmax.f32 %v594_v18, %v595_v25  ;;  %v1441_v34 = vmax.f32 %v631_v6, %v632_v16  ;;  %v610_v35 = vmax.f32 %v608_v19, %v609_v28  ;;  %v616_v36 = vrot.slane %v615_v29, 4 }
 0x110   :  { %v563_v38 = vmax.f32 %v561_v52, %v562_v63  ;;  %v570_v39 = vmax.f32 %v568_v22, %v569_v31  ;;  %v603_v42 = vmax.f32 %v601_v27, %v602_v33  ;;  %v575_v43 = vmax.f32 %v573_v11, %v574_v24 }
 0x111   :  { %v597_v40 = vrot.slane %v596_v32, 2  ;;  %v611_v44 = vrot.slane %v610_v35, 2  ;;  %v617_v45 = vmax.f32 %v615_v29, %v616_v36  ;;  %v486_v46 = vcombine.high %v1424_v1, %v1424_v1 }
 0x112   :  { %v580_v47 = vsel %vm537_vm8, %v1424_v1, -inf  ;;  %v604_v49 = vrot.slane %v603_v42, 2  ;;  %v564_v50 = vrot.slane %v563_v38, 1  ;;  %v576_v51 = vrot.slane %v575_v43, 2 }
 0x113   :  { %v598_v48 = vmax.f32 %v596_v32, %v597_v40  ;;  %v612_v52 = vmax.f32 %v610_v35, %v611_v44  ;;  %v618_v53 = vrot.slane %v617_v45, 2  ;;  %v571_v54 = vrot.slane %v570_v39, 1 }
 0x114   :  { %v581_v55 = vrot.slane %v580_v47, 4  ;;  %v605_v57 = vmax.f32 %v603_v42, %v604_v49  ;;  %v558_v60 = vmax.f32 %v1419_v59, %v557_v12  ;;  %v577_v61 = vmax.f32 %v575_v43, %v576_v51  ;;  %v854_v49 = vld [vmem:[#allocation2 + $0x50] sm:$0xff] }
 0x115   :  { %v599_v56 = vrot.slane %v598_v48, 1  ;;  %v613_v62 = vrot.slane %v612_v52, 1  ;;  %v619_v63 = vmax.f32 %v617_v45, %v618_v53  ;;  %v587_v2 = vsel %vm537_vm8, %v486_v46, -inf }
 0x116   :  { %v582_v1 = vmax.f32 %v580_v47, %v581_v55  ;;  %v606_v5 = vrot.slane %v605_v57, 1  ;;  %v565_v6 = vmax.f32 %v563_v38, %v564_v50  ;;  %v578_v7 = vrot.slane %v577_v61, 1  ;;  %v855_v50 = vld [vmem:[#allocation2 + $0x58] sm:$0xff] }
 0x117   :  { %v588_v8 = vrot.slane %v587_v2, 4  ;;  %v600_v9 = vmax.f32 %v598_v48, %v599_v56  ;;  %v620_v10 = vrot.slane %v619_v63, 1  ;;  %v572_v11 = vmax.f32 %v570_v39, %v571_v54 }
 0x118   :  { %v583_v14 = vrot.slane %v582_v1, 2  ;;  %v607_v15 = vmax.f32 %v605_v57, %v606_v5  ;;  %v614_v16 = vmax.f32 %v612_v52, %v613_v62  ;;  %v640_v59 = vmax.f32 %v1421_v0, %v639_v20 }
 0x119   :  { %v589_v17 = vmax.f32 %v587_v2, %v588_v8  ;;  %v579_v12 = vmax.f32 %v577_v61, %v578_v7  ;;  %v634_v19 = vrot.slane %v1441_v34, 1  ;;  %v643_v22 = vsel %vm537_vm8, %v520_v58, -inf }
 0x11a   :  { %v584_v18 = vmax.f32 %v582_v1, %v583_v14  ;;  %v621_v25 = vmax.f32 %v619_v63, %v620_v10  ;;  %v644_v27 = vrot.slane %v643_v22, 4  ;;  %v671_v28 = vsel %vm670_vm9, %v551_v26, %v1426_v3 }
 0x11b   :  { %v590_v24 = vrot.slane %v589_v17, 2  ;;  %v641_v31 = vrot.slane %v640_v59, 1  ;;  %v673_v32 = vsel %vm672_vm10, %v558_v60, %v671_v28  ;;  %v684_v0 = vsel %vm670_vm9, %v607_v15, %v600_v9 }
 0x11c   :  { %v585_v29 = vrot.slane %v584_v18, 1  ;;  %v628_v20 = vmax.f32 %v1433_v13, %v627_v30  ;;  %v645_v37 = vmax.f32 %v643_v22, %v644_v27  ;;  %v675_v58 = vsel %vm674_vm11, %v565_v6, %v673_v32 }
 0x11d   :  { %v591_v33 = vmax.f32 %v589_v17, %v590_v24  ;;  %v635_v36 = vmax.f32 %v1441_v34, %v634_v19  ;;  %v677_v38 = vsel %vm676_vm12, %v572_v11, %v675_v58  ;;  %v685_v3 = vsel %vm672_vm10, %v614_v16, %v684_v0  ;;  %v1142_v16 = vld [vmem:[%s1517_s4] ss:$0 sm:$0xff] }
 0x11e   :  { %v586_v35 = vmax.f32 %v584_v18, %v585_v29  ;;  %v646_v39 = vrot.slane %v645_v37, 2  ;;  %v679_v40 = vsel %vm678_vm13, %v579_v12, %v677_v38  ;;  %v686_v42 = vsel %vm674_vm11, %v621_v25, %v685_v3 }
 0x11f   :  { %v592_v26 = vrot.slane %v591_v33, 1  ;;  %v642_v43 = vmax.f32 %v640_v59, %v641_v31  ;;  %v687_v30 = vsel %vm676_vm12, %v628_v20, %v686_v42  ;;  %v1253_v52 = vpack.c.bf16 %v855_v50, %v854_v49 }
 0x120   :  { %v681_v13 = vsel %vm680_vm14, %v586_v35, %v679_v40  ;;  %v647_v45 = vmax.f32 %v645_v37, %v646_v39  ;;  %v688_v34 = vsel %vm678_vm13, %v635_v36, %v687_v30  ;;  %v942_v54 = vand.u32 7, %v1384_v41 }
 0x121   :  { %v593_v44 = vmax.f32 %v591_v33, %v592_v26  ;;  %v689_v46 = vsel %vm680_vm14, %v642_v43, %v688_v34  ;;  %v935_v55 = vand.u32 7, %v1373_v23 }
 0x122   :  { %v648_v47 = vrot.slane %v647_v45, 1  ;;  %vm956_vm1 = vcmp.eq.s32.totalorder %v942_v54, 0  ;;  %vm969_vm6 = vcmp.eq.s32.totalorder %v942_v54, 7 }
 0x123   :  { %v683_v48 = vsel %vm682_vm15, %v593_v44, %v681_v13  ;;  %vm955_vm3 = vcmp.eq.s32.totalorder %v935_v55, 0  ;;  %vm968_vm4 = vcmp.eq.s32.totalorder %v935_v55, 7 }
 0x124   :  { %1208 = vmatprep.mubr.msk.f32.mxu1 %vm691_vm0, %v683_v48  ;;  %1219 = vmatprep.mubr.msk.f32.mxu0 %vm691_vm0, %v683_v48  ;;  %v649_v51 = vmax.f32 %v647_v45, %v648_v47 }
 0x126   :  { %v690_v53 = vsel %vm682_vm15, %v649_v51, %v689_v46 }
 0x127   :  { %1209 = vmatmul.mubr.msk.f32.vlgmr.msra.gmra.mrb[4].mxu1 %vm691_vm0, %v690_v53  ;;  %1220 = vmatmul.mubr.msk.f32.vlgmr.msra.gmra.mrb[8].mxu0 %vm691_vm0, %v690_v53 }
 0x128   :  { %1252 = vmatpush3.bf16.msra.mxu1 %v1370_v21  ;;  %1230 = vmatprep.mubr.msk.f32.mxu1 %vm691_vm0, %v683_v48 }
 0x129   :  { %1254 = vmatprep.subr.bf16.mxu1 %v1253_v52 }
 0x12c   :  { %1256 = vmatpush3.bf16.msra.mxu1 %v1253_v52 }
 0x12f   :  { %1231 = vmatmul.mubr.msk.f32.vlgmr.msra.gmra.mrb[6].mxu1 %vm691_vm0, %v690_v53 }
 0x1fa   :  { %v1210_v56 = vpop.f32.mrb[4].mxu1  ;;  %v1221_v57 = vpop.f32.mrb[8].mxu0 }
 0x1fb   :  { %v958_v60 = vrot.slane %v1210_v56, 7  ;;  %v762_v61 = vpop.f32.mrb[5].mxu1  ;;  %v842_v62 = vpop.f32.mrb[9].mxu0 }
 0x1fc   :  { %v961_v63 = vrot.slane %v762_v61, 7 }
 0x1fe   :  { %v962_v21 = vsel %vm384_vm2, %v961_v63, %v958_v60  ;;  %v965_v1 = vsel %vm384_vm2, %v958_v60, %v961_v63 }
 0x1ff   :  { %v967_v2 = vsel %vm956_vm1, 0.0, %v962_v21  ;;  %v966_v5 = vsel %vm955_vm3, 0.0, %v965_v1 }
 0x200   :  { %v982_v6 = vadd.f32 %v1221_v57, %v967_v2  ;;  %v981_v7 = vadd.f32 %v966_v5, %v842_v62 }
 0x202   :  { %v1232_v8 = vpop.f32.mrb[6].mxu1 }
 0x203   :  { %v973_v41 = vrot.slane %v1232_v8, 1  ;;  %v922_v9 = vpop.f32.mrb[7].mxu1 }
 0x204   :  { %v972_v23 = vrot.slane %v922_v9, 1 }
 0x206   :  { %v974_v10 = vsel %vm408_vm5, %v972_v23, %v973_v41  ;;  %v978_v11 = vsel %vm408_vm5, %v973_v41, %v972_v23 }
 0x207   :  { %v979_v14 = vsel %vm968_vm4, 0.0, %v974_v10  ;;  %v980_v15 = vsel %vm969_vm6, 0.0, %v978_v11 }
 0x208   :  { %v983_v17 = vadd.f32 %v981_v7, %v979_v14  ;;  %v984_v59 = vadd.f32 %v982_v6, %v980_v15 }
 0x20a   :  { %v992_v12 = vadd.f32 %v1142_v16, %v983_v17  ;;  %v993_v18 = vadd.f32 %v1142_v16, %v984_v59 }
 0x20c   :  { %v994_v19 = vmax.f32 %v992_v12, 0.0  ;;  %v995_v22 = vmax.f32 %v993_v18, 0.0 }
 0x20e   :  { %v998_v24 = vcombine.high %v994_v19, %v994_v19  ;;  %v1005_v25 = vrot.slane %v994_v19, %v1397_v4  ;;  %v1015_v27 = vcombine.high %v995_v22, %v995_v22  ;;  %v1022_v28 = vrot.slane %v995_v22, %v1397_v4 }
 0x210   :  { %v1012_v29 = vrot.slane %v998_v24, %v1397_v4  ;;  %v1013_v31 = vcombine.high %v1005_v25, %v1005_v25  ;;  %v1029_v32 = vrot.slane %v1015_v27, %v1397_v4  ;;  %v1030_v0 = vcombine.high %v1022_v28, %v1022_v28 }
 0x211   :  { %v1040_v20 = vsel %vm537_vm8, %v1005_v25, -inf  ;;  %v1068_v33 = vsel %vm537_vm8, %v1022_v28, -inf }
 0x212   :  { %v1014_v37 = vcombine.high %v1012_v29, %v1012_v29  ;;  %v1031_v58 = vcombine.high %v1029_v32, %v1029_v32  ;;  %v1041_v35 = vrot.slane %v1040_v20, 4  ;;  %v1047_v36 = vsel %vm537_vm8, %v1013_v31, -inf }
 0x213   :  { %v1048_v38 = vrot.slane %v1047_v36, 4  ;;  %v1054_v3 = vsel %vm537_vm8, %v1012_v29, -inf  ;;  %v1069_v26 = vrot.slane %v1068_v33, 4  ;;  %v1075_v39 = vsel %vm537_vm8, %v1030_v0, -inf }
 0x214   :  { %v1042_v40 = vmax.f32 %v1040_v20, %v1041_v35  ;;  %v1055_v42 = vrot.slane %v1054_v3, 4  ;;  %v1061_v4 = vsel %vm537_vm8, %v1014_v37, -inf  ;;  %v1076_v43 = vrot.slane %v1075_v39, 4 }
 0x215   :  { %v1049_v13 = vmax.f32 %v1047_v36, %v1048_v38  ;;  %v1062_v30 = vrot.slane %v1061_v4, 4  ;;  %v1070_v44 = vmax.f32 %v1068_v33, %v1069_v26  ;;  %v1082_v45 = vsel %vm537_vm8, %v1029_v32, -inf }
 0x216   :  { %v1043_v34 = vrot.slane %v1042_v40, 2  ;;  %v1056_v46 = vmax.f32 %v1054_v3, %v1055_v42  ;;  %v1077_v47 = vmax.f32 %v1075_v39, %v1076_v43  ;;  %v1083_v48 = vrot.slane %v1082_v45, 4 }
 0x217   :  { %v1050_v49 = vrot.slane %v1049_v13, 2  ;;  %v1063_v50 = vmax.f32 %v1061_v4, %v1062_v30  ;;  %v1071_v51 = vrot.slane %v1070_v44, 2  ;;  %v1089_v52 = vsel %vm537_vm8, %v1031_v58, -inf }
 0x218   :  { %v1044_v53 = vmax.f32 %v1042_v40, %v1043_v34  ;;  %v1057_v54 = vrot.slane %v1056_v46, 2  ;;  %v1078_v55 = vrot.slane %v1077_v47, 2  ;;  %v1084_v56 = vmax.f32 %v1082_v45, %v1083_v48 }
 0x219   :  { %v1051_v57 = vmax.f32 %v1049_v13, %v1050_v49  ;;  %v1064_v60 = vrot.slane %v1063_v50, 2  ;;  %v1072_v61 = vmax.f32 %v1070_v44, %v1071_v51  ;;  %v1090_v62 = vrot.slane %v1089_v52, 4 }
 0x21a   :  { %v1045_v63 = vrot.slane %v1044_v53, 1  ;;  %v1058_v21 = vmax.f32 %v1056_v46, %v1057_v54  ;;  %v1079_v1 = vmax.f32 %v1077_v47, %v1078_v55  ;;  %v1085_v2 = vrot.slane %v1084_v56, 2 }
 0x21b   :  { %v1052_v5 = vrot.slane %v1051_v57, 1  ;;  %v1065_v6 = vmax.f32 %v1063_v50, %v1064_v60  ;;  %v1091_v7 = vmax.f32 %v1089_v52, %v1090_v62  ;;  %v1073_v9 = vrot.slane %v1072_v61, 1 }
 0x21c   :  { %v1046_v8 = vmax.f32 %v1044_v53, %v1045_v63  ;;  %v1059_v41 = vrot.slane %v1058_v21, 1  ;;  %v1086_v23 = vmax.f32 %v1084_v56, %v1085_v2  ;;  %v1080_v14 = vrot.slane %v1079_v1, 1 }
 0x21d   :  { %v1053_v10 = vmax.f32 %v1051_v57, %v1052_v5  ;;  %v1066_v11 = vrot.slane %v1065_v6, 1  ;;  %v1092_v15 = vrot.slane %v1091_v7, 2  ;;  %v1074_v19 = vmax.f32 %v1072_v61, %v1073_v9 }
 0x21e   :  { %v1060_v16 = vmax.f32 %v1058_v21, %v1059_v41  ;;  %v1087_v17 = vrot.slane %v1086_v23, 1  ;;  %v1081_v24 = vmax.f32 %v1079_v1, %v1080_v14 }
 0x21f   :  { %v1067_v59 = vmax.f32 %v1065_v6, %v1066_v11  ;;  %v1093_v12 = vmax.f32 %v1091_v7, %v1092_v15  ;;  %v1104_v18 = vsel %vm670_vm9, %v1053_v10, %v1046_v8 }
 0x220   :  { %v1105_v22 = vsel %vm672_vm10, %v1060_v16, %v1104_v18  ;;  %v1088_v28 = vmax.f32 %v1086_v23, %v1087_v17 }
 0x221   :  { %v1094_v25 = vrot.slane %v1093_v12, 1  ;;  %v1106_v27 = vsel %vm674_vm11, %v1067_v59, %v1105_v22 }
 0x222   :  { %v1107_v29 = vsel %vm676_vm12, %v1074_v19, %v1106_v27 }
 0x223   :  { %v1095_v31 = vmax.f32 %v1093_v12, %v1094_v25  ;;  %v1108_v32 = vsel %vm678_vm13, %v1081_v24, %v1107_v29 }
 0x224   :  { %v1109_v0 = vsel %vm680_vm14, %v1088_v28, %v1108_v32 }
 0x225   :  { %v1110_v20 = vsel %vm682_vm15, %v1095_v31, %v1109_v0 }
 0x226   :  { %1112 = vst.msk [vmem:[%s1518_s5] sm:$0xff] %vm691_vm0, %v1110_v20 }
 0x227   :  { %1117 = vsyncpa [#allocation3], 1 }

</bundles_post_ra>
